<compile_context>
chip_gen: v7x
topology: tpu7x:2x2x1
jax: 0.10.0
libtpu: 0.0.40
codegen_flags: <defaults>
</compile_context>

<pallas_src>
import jax
import jax.numpy as jnp
from jax import lax
from jax.experimental import pallas as pl
from jax.experimental.pallas import tpu as pltpu


def _round_up(x, m):
    return ((x + m - 1) // m) * m


# ----------------------------------------------------------------------------
# Pallas kernel.  One (batch, row-tile) block per grid step.
#   xm_ref  : (Cin, L)        main row block, flattened (TH rows x Wp cols), bf16
#   xh_ref  : (Cin, 3*Wp)     next 3 padded rows (halo), bf16
#   w_ref   : (10, Cout, Cin) taps 0..8 = w3[dh,dw].T * s2 ; tap 9 = w1.T * s1
#   bn_ref  : (4, Cout, 1)    rows = b1, b2, s3, b3 (f32)
#   o_ref   : (Cout, L)       bf16 output (channel-major, spatial on lanes)
#   xbuf_ref: (Cin, L + 3*Wp) VMEM staging buffer (main ++ halo)
# ----------------------------------------------------------------------------
def respath_kernel(xm_ref, xh_ref, w_ref, bn_ref, o_ref, xbuf_ref):
    L = xm_ref.shape[1]
    wp = xh_ref.shape[-1] // 3

    # Assemble the halo-extended row block once in VMEM; the 3x3 taps are then
    # just lane-shifted windows of this buffer (in-kernel im2col).
    xbuf_ref[:, :L] = xm_ref[...]
    xbuf_ref[:, L:] = xh_ref[...]

    main = None
    centre = None
    for dh in range(3):
        for dw in range(3):
            k = dh * 3 + dw
            off = dh * wp + dw
            xk = xbuf_ref[:, off:off + L]                     # (Cin, L)
            if k == 4:
                centre = xk                                   # original pixel
            d = jnp.dot(w_ref[k], xk, preferred_element_type=jnp.float32)
            main = d if main is None else main + d            # (Cout, L) f32

    # 1x1 shortcut branch: its own small-K dot (split GEMM).
    shortcut = jnp.dot(w_ref[9], centre, preferred_element_type=jnp.float32)

    b1 = bn_ref[0]     # (Cout, 1)
    b2 = bn_ref[1]
    s3 = bn_ref[2]
    b3 = bn_ref[3]

    main = jnp.maximum(main + b2, 0.0)               # BN2 shift (no affine) + ReLU
    out = jnp.maximum(shortcut + b1 + main, 0.0)     # BN1 shift, add, ReLU
    o_ref[...] = (out * s3 + b3).astype(o_ref.dtype)  # BN3 affine, bf16 store


# ----------------------------------------------------------------------------
# Wrapper: NCHW in / NCHW out.  Only padding / tiny halo gather / final slice
# happen outside the kernel; all conv / BN / ReLU math runs in Pallas.
# ----------------------------------------------------------------------------
def respath_block(x_nchw, params, *, compute_dtype=jnp.bfloat16,
                  out_dtype=jnp.float32, row_tile=None):
    w1, w3, s1, b1, s2, b2, s3, b3 = params
    N, Cin, H, W = x_nchw.shape
    Cout = w1.shape[1]
    assert H >= 2 and W >= 2, "reflection padding requires H, W >= 2"

    itemsize = jnp.dtype(compute_dtype).itemsize
    cin8 = _round_up(Cin, 8)
    cout8 = _round_up(Cout, 8)

    # ---- per-generation VMEM budget (128 MiB v5e/v6e, 64 MiB v7x) ----------
    try:
        vmem_cap = int(pltpu.get_tpu_info().vmem_capacity_bytes)
    except Exception:
        vmem_cap = 64 * 2 ** 20
    vmem_limit = int(min(vmem_cap * 3 // 4, 100 * 2 ** 20))
    budget = vmem_limit // 2        # data budget; rest is compiler headroom

    # When row-tiling, the flattened block length TH*Wp must be a multiple of
    # 128, so pad the width to a multiple of 8 and use TH multiple of 16.
    wp_tiled = _round_up(W + 2, 8)
    per_row = (2 * cin8 * wp_tiled * itemsize       # main input, double-buffered
               + 2 * cout8 * wp_tiled * itemsize    # bf16 output, double-buffered
               + 2 * cin8 * wp_tiled * itemsize     # xbuf scratch + live window
               + 2 * cout8 * wp_tiled * 4           # f32 main + shortcut
               + cout8 * wp_tiled * 4)              # epilogue temporaries
    th_max = max(16, (budget // per_row) // 16 * 16)
    if row_tile is not None:
        th_max = max(16, (int(row_tile) // 16) * 16)

    if th_max >= H:
        th, n_t, wp = H, 1, W + 2                   # single tile: no constraints
    else:
        th, wp = th_max, wp_tiled
        n_t = -(-H // th)

    L = th * wp
    hp_tot = n_t * th + 3                           # padded rows kept in HBM

    # ---- reflection pad (1 px), then zero-pad rows/cols; channel-major -----
    xp = jnp.pad(x_nchw.astype(compute_dtype),
                 ((0, 0), (0, 0), (1, 1), (1, 1)), mode="reflect")
    xp = jnp.pad(xp, ((0, 0), (0, 0), (0, hp_tot - (H + 2)), (0, wp - (W + 2))))

    # Main blocks: non-overlapping TH-row chunks, flattened spatial on lanes.
    xmain = xp[:, :, :n_t * th, :].reshape(N, Cin, n_t * L)
    # Halo: the 3 padded rows following each tile (tiny array, exact bytes).
    rows = (jnp.arange(n_t) + 1) * th
    xhalo = xp[:, :, rows[:, None] + jnp.arange(3)[None, :], :]   # (N,Cin,n_t,3,wp)
    xhalo = jnp.transpose(xhalo, (0, 2, 1, 3, 4)).reshape(N, n_t, Cin, 3 * wp)

    # ---- fold BN1/BN2 scales into the (transposed) conv weights ------------
    w3t = jnp.transpose(w3, (0, 1, 3, 2)) * s2[None, None, :, None]  # (3,3,Cout,Cin)
    wt = jnp.concatenate(
        [w3t.reshape(9, Cout, Cin), (w1.T * s1[:, None])[None]], axis=0
    ).astype(compute_dtype)                                          # (10,Cout,Cin)
    bn = jnp.stack([b1, b2, s3, b3]).reshape(4, Cout, 1).astype(jnp.float32)

    out = pl.pallas_call(
        respath_kernel,
        out_shape=jax.ShapeDtypeStruct((N, Cout, n_t * L), compute_dtype),
        grid_spec=pltpu.PrefetchScalarGridSpec(
            num_scalar_prefetch=0,
            grid=(N, n_t),
            in_specs=[
                pl.BlockSpec((None, Cin, L), lambda n, t: (n, 0, t)),
                pl.BlockSpec((None, None, Cin, 3 * wp), lambda n, t: (n, t, 0, 0)),
                pl.BlockSpec((10, Cout, Cin), lambda n, t: (0, 0, 0)),
                pl.BlockSpec((4, Cout, 1), lambda n, t: (0, 0, 0)),
            ],
            out_specs=pl.BlockSpec((None, Cout, L), lambda n, t: (n, 0, t)),
            scratch_shapes=[pltpu.VMEM((Cin, L + 3 * wp), compute_dtype)],
        ),
        compiler_params=pltpu.CompilerParams(
            dimension_semantics=("parallel", "parallel"),
            vmem_limit_bytes=vmem_limit,
        ),
    )(xmain, xhalo, wt, bn)

    # Drop the pad rows / pad columns; already NCHW (no transpose pass).
    out = out.reshape(N, Cout, n_t * th, wp)[:, :, :H, :W].astype(out_dtype)
    return out


# ----------------------------------------------------------------------------
# References for correctness checks.
# ----------------------------------------------------------------------------
def respath_block_ref(x_nchw, params):
    """True module semantics (eval-mode BN), f32, highest matmul precision."""
    w1, w3, s1, b1, s2, b2, s3, b3 = params
    x = jnp.transpose(x_nchw, (0, 2, 3, 1))
    shortcut = jnp.einsum("nhwc,cf->nhwf", x, w1,
                          precision=lax.Precision.HIGHEST) * s1 + b1
    xpad = jnp.pad(x, ((0, 0), (1, 1), (1, 1), (0, 0)), mode="reflect")
    out = lax.conv_general_dilated(
        xpad, w3, window_strides=(1, 1), padding="VALID",
        dimension_numbers=("NHWC", "HWIO", "NHWC"),
        precision=lax.Precision.HIGHEST)
    out = jnp.maximum(out * s2 + b2, 0.0)
    out = jnp.maximum(shortcut + out, 0.0)
    out = out * s3 + b3
    return jnp.transpose(out, (0, 3, 1, 2))


def respath_block_struct_ref(x_nchw, params, compute_dtype):
    """Structural reference mirroring the kernel's folded / cast operands."""
    w1, w3, s1, b1, s2, b2, s3, b3 = params
    N, Cin, H, W = x_nchw.shape
    Cout = w1.shape[1]
    xp = jnp.pad(x_nchw.astype(compute_dtype),
                 ((0, 0), (0, 0), (1, 1), (1, 1)), mode="reflect")
    w3t = (jnp.transpose(w3, (0, 1, 3, 2)) *
           s2[None, None, :, None]).astype(compute_dtype)
    w1t = (w1.T * s1[:, None]).astype(compute_dtype)
    main = None
    for dh in range(3):
        for dw in range(3):
            xk = xp[:, :, dh:dh + H, dw:dw + W]
            term = jnp.einsum("oc,nchw->nohw", w3t[dh, dw], xk,
                              preferred_element_type=jnp.float32)
            main = term if main is None else main + term
    short = jnp.einsum("oc,nchw->nohw", w1t, xp[:, :, 1:1 + H, 1:1 + W],
                       preferred_element_type=jnp.float32)
    out = jnp.maximum(
        short + b1[:, None, None] + jnp.maximum(main + b2[:, None, None], 0.0),
        0.0)
    out = out * s3[:, None, None] + b3[:, None, None]
    # mirror the kernel's bf16 store + f32 upcast
    return out.astype(compute_dtype).astype(jnp.float32)


def make_params(key, in_channels, filters):
    ks = jax.random.split(key, 12)
    eps = 1e-5
    w1 = jax.random.normal(ks[0], (in_channels, filters), jnp.float32) * 0.2
    w3 = jax.random.normal(ks[1], (3, 3, in_channels, filters), jnp.float32) * 0.2
    # BN1 (affine=True)
    g1 = 1.0 + 0.1 * jax.random.normal(ks[2], (filters,), jnp.float32)
    be1 = 0.1 * jax.random.normal(ks[3], (filters,), jnp.float32)
    m1 = 0.1 * jax.random.normal(ks[4], (filters,), jnp.float32)
    v1 = jax.random.uniform(ks[5], (filters,), jnp.float32, 0.5, 1.5)
    # BN2 (affine=False)
    m2 = 0.1 * jax.random.normal(ks[6], (filters,), jnp.float32)
    v2 = jax.random.uniform(ks[7], (filters,), jnp.float32, 0.5, 1.5)
    # BN3 (affine=True)
    g3 = 1.0 + 0.1 * jax.random.normal(ks[8], (filters,), jnp.float32)
    be3 = 0.1 * jax.random.normal(ks[9], (filters,), jnp.float32)
    m3 = 0.1 * jax.random.normal(ks[10], (filters,), jnp.float32)
    v3 = jax.random.uniform(ks[11], (filters,), jnp.float32, 0.5, 1.5)

    s1 = g1 / jnp.sqrt(v1 + eps); b1 = be1 - m1 * s1
    s2 = 1.0 / jnp.sqrt(v2 + eps); b2 = -m2 * s2
    s3 = g3 / jnp.sqrt(v3 + eps); b3 = be3 - m3 * s3
    return (w1, w3, s1, b1, s2, b2, s3, b3)


if __name__ == "__main__":
    key = jax.random.PRNGKey(0)
    k_x, k_p, k_x2 = jax.random.split(key, 3)

    N, Cin, H, W = 2, 4, 16, 16
    filters = 8

    x = jax.random.normal(k_x, (N, Cin, H, W), jnp.float32)
    params = make_params(k_p, Cin, filters)

    ref_true = jax.block_until_ready(respath_block_ref(x, params))
    ref_struct = jax.block_until_ready(
        respath_block_struct_ref(x, params, jnp.bfloat16))

    # single row-tile path
    out = jax.block_until_ready(respath_block(x, params))
    assert out.shape == (N, filters, H, W)
    assert jnp.allclose(out, ref_struct, atol=2e-2, rtol=2e-2), \
        "mismatch vs structural reference"
    assert jnp.allclose(out, ref_true, atol=1e-1, rtol=1e-1), \
        "mismatch vs f32 module reference"

    # multi row-tile path (exercises halo handling and block divisibility)
    H2, W2 = 48, 16
    x2 = jax.random.normal(k_x2, (1, Cin, H2, W2), jnp.float32)
    ref2_true = jax.block_until_ready(respath_block_ref(x2, params))
    ref2_struct = jax.block_until_ready(
        respath_block_struct_ref(x2, params, jnp.bfloat16))
    out2 = jax.block_until_ready(respath_block(x2, params, row_tile=16))
    assert out2.shape == (1, filters, H2, W2)
    assert jnp.allclose(out2, ref2_struct, atol=2e-2, rtol=2e-2), \
        "mismatch vs structural reference (tiled)"
    assert jnp.allclose(out2, ref2_true, atol=1e-1, rtol=1e-1), \
        "mismatch vs f32 module reference (tiled)"

    print("KERNEL_OK")
</pallas_src>

<mosaic_0001>
module attributes {stable_mosaic.version = 11 : i64} {
  func.func @respath_kernel(%arg0: i32, %arg1: i32, %arg2: memref<1x4x288xbf16, #tpu.memory_space<vmem>>, %arg3: memref<1x1x4x54xbf16, #tpu.memory_space<vmem>>, %arg4: memref<10x8x4xbf16, #tpu.memory_space<vmem>>, %arg5: memref<4x8x1xf32, #tpu.memory_space<vmem>>, %arg6: memref<1x8x288xbf16, #tpu.memory_space<vmem>>, %arg7: memref<4x342xbf16, #tpu.memory_space<vmem>>) attributes {dimension_semantics = [#tpu.dimension_semantics<parallel>, #tpu.dimension_semantics<parallel>], iteration_bounds = array<i64: 2, 1>, scalar_prefetch = 0 : i64, scratch_operands = 1 : i64, tpu.core_type = #tpu.core_type<tc>, window_params = [{transform_indices = @transform_0, window_bounds = array<i64: 1, 4, 288>}, {transform_indices = @transform_1, window_bounds = array<i64: 1, 1, 4, 54>}, {pipeline_mode = #tpu.pipeline_mode<synchronous>, transform_indices = @transform_2, window_bounds = array<i64: 10, 8, 4>}, {pipeline_mode = #tpu.pipeline_mode<synchronous>, transform_indices = @transform_3, window_bounds = array<i64: 4, 8, 1>}, {transform_indices = @transform_4, window_bounds = array<i64: 1, 8, 288>}]} {
    %c0 = arith.constant 0 : index
    %c0_0 = arith.constant 0 : index
    %c0_1 = arith.constant 0 : index
    %0 = vector.load %arg2[%c0, %c0_0, %c0_1] : memref<1x4x288xbf16, #tpu.memory_space<vmem>>, vector<1x4x288xbf16>
    %1 = vector.shape_cast %0 : vector<1x4x288xbf16> to vector<4x288xbf16>
    %c0_2 = arith.constant 0 : index
    %c0_3 = arith.constant 0 : index
    %2 = vector.load %arg7[%c0_2, %c0_3] : memref<4x342xbf16, #tpu.memory_space<vmem>>, vector<4x288xbf16>
    tpu.vector_store %arg7[%c0_2, %c0_3], %1 {strides = array<i32>} : memref<4x342xbf16, #tpu.memory_space<vmem>>, vector<4x288xbf16>,
    %c0_4 = arith.constant 0 : index
    %c0_5 = arith.constant 0 : index
    %c0_6 = arith.constant 0 : index
    %c0_7 = arith.constant 0 : index
    %3 = vector.load %arg3[%c0_4, %c0_5, %c0_6, %c0_7] : memref<1x1x4x54xbf16, #tpu.memory_space<vmem>>, vector<1x1x4x54xbf16>
    %4 = vector.shape_cast %3 : vector<1x1x4x54xbf16> to vector<4x54xbf16>
    %c0_8 = arith.constant 0 : index
    %c288 = arith.constant 288 : index
    %5 = vector.load %arg7[%c0_8, %c288] : memref<4x342xbf16, #tpu.memory_space<vmem>>, vector<4x54xbf16>
    tpu.vector_store %arg7[%c0_8, %c288], %4 {strides = array<i32>} : memref<4x342xbf16, #tpu.memory_space<vmem>>, vector<4x54xbf16>,
    %c0_9 = arith.constant 0 : index
    %c0_10 = arith.constant 0 : index
    %6 = vector.load %arg7[%c0_9, %c0_10] : memref<4x342xbf16, #tpu.memory_space<vmem>>, vector<4x288xbf16>
    %c0_11 = arith.constant 0 : index
    %c0_12 = arith.constant 0 : index
    %c0_13 = arith.constant 0 : index
    %7 = vector.load %arg4[%c0_11, %c0_12, %c0_13] : memref<10x8x4xbf16, #tpu.memory_space<vmem>>, vector<1x8x4xbf16>
    %8 = vector.shape_cast %7 : vector<1x8x4xbf16> to vector<8x4xbf16>
    %cst = arith.constant dense<0.000000e+00> : vector<8x288xf32>
    %9 = tpu.matmul %8, %6, %cst {dimension_numbers = #tpu.dot_dimension_numbers<[1], [0], [0], [1], [0, 0, 1, 1], [], []>} : vector<8x4xbf16>, vector<4x288xbf16>, vector<8x288xf32> -> vector<8x288xf32>
    %c0_14 = arith.constant 0 : index
    %c1 = arith.constant 1 : index
    %10 = vector.load %arg7[%c0_14, %c1] : memref<4x342xbf16, #tpu.memory_space<vmem>>, vector<4x288xbf16>
    %c1_15 = arith.constant 1 : index
    %c0_16 = arith.constant 0 : index
    %c0_17 = arith.constant 0 : index
    %11 = vector.load %arg4[%c1_15, %c0_16, %c0_17] : memref<10x8x4xbf16, #tpu.memory_space<vmem>>, vector<1x8x4xbf16>
    %12 = vector.shape_cast %11 : vector<1x8x4xbf16> to vector<8x4xbf16>
    %cst_18 = arith.constant dense<0.000000e+00> : vector<8x288xf32>
    %13 = tpu.matmul %12, %10, %cst_18 {dimension_numbers = #tpu.dot_dimension_numbers<[1], [0], [0], [1], [0, 0, 1, 1], [], []>} : vector<8x4xbf16>, vector<4x288xbf16>, vector<8x288xf32> -> vector<8x288xf32>
    %14 = arith.addf %9, %13 : vector<8x288xf32>
    %c0_19 = arith.constant 0 : index
    %c2 = arith.constant 2 : index
    %15 = vector.load %arg7[%c0_19, %c2] : memref<4x342xbf16, #tpu.memory_space<vmem>>, vector<4x288xbf16>
    %c2_20 = arith.constant 2 : index
    %c0_21 = arith.constant 0 : index
    %c0_22 = arith.constant 0 : index
    %16 = vector.load %arg4[%c2_20, %c0_21, %c0_22] : memref<10x8x4xbf16, #tpu.memory_space<vmem>>, vector<1x8x4xbf16>
    %17 = vector.shape_cast %16 : vector<1x8x4xbf16> to vector<8x4xbf16>
    %cst_23 = arith.constant dense<0.000000e+00> : vector<8x288xf32>
    %18 = tpu.matmul %17, %15, %cst_23 {dimension_numbers = #tpu.dot_dimension_numbers<[1], [0], [0], [1], [0, 0, 1, 1], [], []>} : vector<8x4xbf16>, vector<4x288xbf16>, vector<8x288xf32> -> vector<8x288xf32>
    %19 = arith.addf %14, %18 : vector<8x288xf32>
    %c0_24 = arith.constant 0 : index
    %c18 = arith.constant 18 : index
    %20 = vector.load %arg7[%c0_24, %c18] : memref<4x342xbf16, #tpu.memory_space<vmem>>, vector<4x288xbf16>
    %c3 = arith.constant 3 : index
    %c0_25 = arith.constant 0 : index
    %c0_26 = arith.constant 0 : index
    %21 = vector.load %arg4[%c3, %c0_25, %c0_26] : memref<10x8x4xbf16, #tpu.memory_space<vmem>>, vector<1x8x4xbf16>
    %22 = vector.shape_cast %21 : vector<1x8x4xbf16> to vector<8x4xbf16>
    %cst_27 = arith.constant dense<0.000000e+00> : vector<8x288xf32>
    %23 = tpu.matmul %22, %20, %cst_27 {dimension_numbers = #tpu.dot_dimension_numbers<[1], [0], [0], [1], [0, 0, 1, 1], [], []>} : vector<8x4xbf16>, vector<4x288xbf16>, vector<8x288xf32> -> vector<8x288xf32>
    %24 = arith.addf %19, %23 : vector<8x288xf32>
    %c0_28 = arith.constant 0 : index
    %c19 = arith.constant 19 : index
    %25 = vector.load %arg7[%c0_28, %c19] : memref<4x342xbf16, #tpu.memory_space<vmem>>, vector<4x288xbf16>
    %c4 = arith.constant 4 : index
    %c0_29 = arith.constant 0 : index
    %c0_30 = arith.constant 0 : index
    %26 = vector.load %arg4[%c4, %c0_29, %c0_30] : memref<10x8x4xbf16, #tpu.memory_space<vmem>>, vector<1x8x4xbf16>
    %27 = vector.shape_cast %26 : vector<1x8x4xbf16> to vector<8x4xbf16>
    %cst_31 = arith.constant dense<0.000000e+00> : vector<8x288xf32>
    %28 = tpu.matmul %27, %25, %cst_31 {dimension_numbers = #tpu.dot_dimension_numbers<[1], [0], [0], [1], [0, 0, 1, 1], [], []>} : vector<8x4xbf16>, vector<4x288xbf16>, vector<8x288xf32> -> vector<8x288xf32>
    %29 = arith.addf %24, %28 : vector<8x288xf32>
    %c0_32 = arith.constant 0 : index
    %c20 = arith.constant 20 : index
    %30 = vector.load %arg7[%c0_32, %c20] : memref<4x342xbf16, #tpu.memory_space<vmem>>, vector<4x288xbf16>
    %c5 = arith.constant 5 : index
    %c0_33 = arith.constant 0 : index
    %c0_34 = arith.constant 0 : index
    %31 = vector.load %arg4[%c5, %c0_33, %c0_34] : memref<10x8x4xbf16, #tpu.memory_space<vmem>>, vector<1x8x4xbf16>
    %32 = vector.shape_cast %31 : vector<1x8x4xbf16> to vector<8x4xbf16>
    %cst_35 = arith.constant dense<0.000000e+00> : vector<8x288xf32>
    %33 = tpu.matmul %32, %30, %cst_35 {dimension_numbers = #tpu.dot_dimension_numbers<[1], [0], [0], [1], [0, 0, 1, 1], [], []>} : vector<8x4xbf16>, vector<4x288xbf16>, vector<8x288xf32> -> vector<8x288xf32>
    %34 = arith.addf %29, %33 : vector<8x288xf32>
    %c0_36 = arith.constant 0 : index
    %c36 = arith.constant 36 : index
    %35 = vector.load %arg7[%c0_36, %c36] : memref<4x342xbf16, #tpu.memory_space<vmem>>, vector<4x288xbf16>
    %c6 = arith.constant 6 : index
    %c0_37 = arith.constant 0 : index
    %c0_38 = arith.constant 0 : index
    %36 = vector.load %arg4[%c6, %c0_37, %c0_38] : memref<10x8x4xbf16, #tpu.memory_space<vmem>>, vector<1x8x4xbf16>
    %37 = vector.shape_cast %36 : vector<1x8x4xbf16> to vector<8x4xbf16>
    %cst_39 = arith.constant dense<0.000000e+00> : vector<8x288xf32>
    %38 = tpu.matmul %37, %35, %cst_39 {dimension_numbers = #tpu.dot_dimension_numbers<[1], [0], [0], [1], [0, 0, 1, 1], [], []>} : vector<8x4xbf16>, vector<4x288xbf16>, vector<8x288xf32> -> vector<8x288xf32>
    %39 = arith.addf %34, %38 : vector<8x288xf32>
    %c0_40 = arith.constant 0 : index
    %c37 = arith.constant 37 : index
    %40 = vector.load %arg7[%c0_40, %c37] : memref<4x342xbf16, #tpu.memory_space<vmem>>, vector<4x288xbf16>
    %c7 = arith.constant 7 : index
    %c0_41 = arith.constant 0 : index
    %c0_42 = arith.constant 0 : index
    %41 = vector.load %arg4[%c7, %c0_41, %c0_42] : memref<10x8x4xbf16, #tpu.memory_space<vmem>>, vector<1x8x4xbf16>
    %42 = vector.shape_cast %41 : vector<1x8x4xbf16> to vector<8x4xbf16>
    %cst_43 = arith.constant dense<0.000000e+00> : vector<8x288xf32>
    %43 = tpu.matmul %42, %40, %cst_43 {dimension_numbers = #tpu.dot_dimension_numbers<[1], [0], [0], [1], [0, 0, 1, 1], [], []>} : vector<8x4xbf16>, vector<4x288xbf16>, vector<8x288xf32> -> vector<8x288xf32>
    %44 = arith.addf %39, %43 : vector<8x288xf32>
    %c0_44 = arith.constant 0 : index
    %c38 = arith.constant 38 : index
    %45 = vector.load %arg7[%c0_44, %c38] : memref<4x342xbf16, #tpu.memory_space<vmem>>, vector<4x288xbf16>
    %c8 = arith.constant 8 : index
    %c0_45 = arith.constant 0 : index
    %c0_46 = arith.constant 0 : index
    %46 = vector.load %arg4[%c8, %c0_45, %c0_46] : memref<10x8x4xbf16, #tpu.memory_space<vmem>>, vector<1x8x4xbf16>
    %47 = vector.shape_cast %46 : vector<1x8x4xbf16> to vector<8x4xbf16>
    %cst_47 = arith.constant dense<0.000000e+00> : vector<8x288xf32>
    %48 = tpu.matmul %47, %45, %cst_47 {dimension_numbers = #tpu.dot_dimension_numbers<[1], [0], [0], [1], [0, 0, 1, 1], [], []>} : vector<8x4xbf16>, vector<4x288xbf16>, vector<8x288xf32> -> vector<8x288xf32>
    %49 = arith.addf %44, %48 : vector<8x288xf32>
    %c9 = arith.constant 9 : index
    %c0_48 = arith.constant 0 : index
    %c0_49 = arith.constant 0 : index
    %50 = vector.load %arg4[%c9, %c0_48, %c0_49] : memref<10x8x4xbf16, #tpu.memory_space<vmem>>, vector<1x8x4xbf16>
    %51 = vector.shape_cast %50 : vector<1x8x4xbf16> to vector<8x4xbf16>
    %cst_50 = arith.constant dense<0.000000e+00> : vector<8x288xf32>
    %52 = tpu.matmul %51, %25, %cst_50 {dimension_numbers = #tpu.dot_dimension_numbers<[1], [0], [0], [1], [0, 0, 1, 1], [], []>} : vector<8x4xbf16>, vector<4x288xbf16>, vector<8x288xf32> -> vector<8x288xf32>
    %c0_51 = arith.constant 0 : index
    %c0_52 = arith.constant 0 : index
    %c0_53 = arith.constant 0 : index
    %53 = vector.load %arg5[%c0_51, %c0_52, %c0_53] : memref<4x8x1xf32, #tpu.memory_space<vmem>>, vector<1x8x1xf32>
    %54 = vector.shape_cast %53 : vector<1x8x1xf32> to vector<8x1xf32>
    %c1_54 = arith.constant 1 : index
    %c0_55 = arith.constant 0 : index
    %c0_56 = arith.constant 0 : index
    %55 = vector.load %arg5[%c1_54, %c0_55, %c0_56] : memref<4x8x1xf32, #tpu.memory_space<vmem>>, vector<1x8x1xf32>
    %56 = vector.shape_cast %55 : vector<1x8x1xf32> to vector<8x1xf32>
    %c2_57 = arith.constant 2 : index
    %c0_58 = arith.constant 0 : index
    %c0_59 = arith.constant 0 : index
    %57 = vector.load %arg5[%c2_57, %c0_58, %c0_59] : memref<4x8x1xf32, #tpu.memory_space<vmem>>, vector<1x8x1xf32>
    %58 = vector.shape_cast %57 : vector<1x8x1xf32> to vector<8x1xf32>
    %c3_60 = arith.constant 3 : index
    %c0_61 = arith.constant 0 : index
    %c0_62 = arith.constant 0 : index
    %59 = vector.load %arg5[%c3_60, %c0_61, %c0_62] : memref<4x8x1xf32, #tpu.memory_space<vmem>>, vector<1x8x1xf32>
    %60 = vector.shape_cast %59 : vector<1x8x1xf32> to vector<8x1xf32>
    %61 = vector.broadcast %56 : vector<8x1xf32> to vector<8x288xf32>
    %62 = arith.addf %49, %61 : vector<8x288xf32>
    %cst_63 = arith.constant 0.000000e+00 : f32
    %63 = vector.broadcast %cst_63 : f32 to vector<8x288xf32>
    %64 = arith.maximumf %62, %63 : vector<8x288xf32>
    %65 = vector.broadcast %54 : vector<8x1xf32> to vector<8x288xf32>
    %66 = arith.addf %52, %65 : vector<8x288xf32>
    %67 = arith.addf %66, %64 : vector<8x288xf32>
    %cst_64 = arith.constant 0.000000e+00 : f32
    %68 = vector.broadcast %cst_64 : f32 to vector<8x288xf32>
    %69 = arith.maximumf %67, %68 : vector<8x288xf32>
    %70 = vector.broadcast %58 : vector<8x1xf32> to vector<8x288xf32>
    %71 = arith.mulf %69, %70 : vector<8x288xf32>
    %72 = vector.broadcast %60 : vector<8x1xf32> to vector<8x288xf32>
    %73 = arith.addf %71, %72 : vector<8x288xf32>
    %74 = arith.truncf %73 : vector<8x288xf32> to vector<8x288xbf16>
    %c0_65 = arith.constant 0 : index
    %c0_66 = arith.constant 0 : index
    %c0_67 = arith.constant 0 : index
    %75 = vector.load %arg6[%c0_65, %c0_66, %c0_67] : memref<1x8x288xbf16, #tpu.memory_space<vmem>>, vector<1x8x288xbf16>
    %76 = vector.shape_cast %75 : vector<1x8x288xbf16> to vector<8x288xbf16>
    %77 = vector.shape_cast %74 : vector<8x288xbf16> to vector<1x8x288xbf16>
    tpu.vector_store %arg6[%c0_65, %c0_66, %c0_67], %77 {strides = array<i32>} : memref<1x8x288xbf16, #tpu.memory_space<vmem>>, vector<1x8x288xbf16>,
    return
  }
  func.func @transform_0(%arg0: i32, %arg1: i32) -> (i32, i32, i32) {
    %c0_i32 = arith.constant 0 : i32
    %c0_i32_0 = arith.constant 0 : i32
    return %arg0, %c0_i32, %arg1 : i32, i32, i32
  }
  func.func @transform_1(%arg0: i32, %arg1: i32) -> (i32, i32, i32, i32) {
    %c0_i32 = arith.constant 0 : i32
    %c0_i32_0 = arith.constant 0 : i32
    %c0_i32_1 = arith.constant 0 : i32
    return %arg0, %arg1, %c0_i32, %c0_i32_0 : i32, i32, i32, i32
  }
  func.func @transform_2(%arg0: i32, %arg1: i32) -> (i32, i32, i32) {
    %c0_i32 = arith.constant 0 : i32
    %c0_i32_0 = arith.constant 0 : i32
    %c0_i32_1 = arith.constant 0 : i32
    %c0_i32_2 = arith.constant 0 : i32
    return %c0_i32, %c0_i32_0, %c0_i32_1 : i32, i32, i32
  }
  func.func @transform_3(%arg0: i32, %arg1: i32) -> (i32, i32, i32) {
    %c0_i32 = arith.constant 0 : i32
    %c0_i32_0 = arith.constant 0 : i32
    %c0_i32_1 = arith.constant 0 : i32
    %c0_i32_2 = arith.constant 0 : i32
    return %c0_i32, %c0_i32_0, %c0_i32_1 : i32, i32, i32
  }
  func.func @transform_4(%arg0: i32, %arg1: i32) -> (i32, i32, i32) {
    %c0_i32 = arith.constant 0 : i32
    %c0_i32_0 = arith.constant 0 : i32
    return %arg0, %c0_i32, %arg1 : i32, i32, i32
  }
}

</mosaic_0001>

<bundles_post_ra>
// kernel: tpu_custom_call.1
= control target key start
LH: loop header
LB: loop body
LE: loop exit
PB: predicated region body
PF: predicated region fallthrough
CT: control target
= control target key end

     0   :  { %9 = vsyncpa [#allocation4], 0  ;;  %s2255_s0 = inlined_call_operand.vmem [shape: bf16[2,4,288], index: 0, kind: input, shape index: {}]   ;;  %s2256_s1 = inlined_call_operand.vmem [shape: bf16[2,1,4,54], index: 1, kind: input, shape index: {}]   ;;  %s2257_s2 = inlined_call_operand.vmem [shape: bf16[10,8,4], index: 2, kind: input, shape index: {}]   ;;  %s2258_s3 = inlined_call_operand.vmem [shape: f32[4,8,1], index: 3, kind: input, shape index: {}]   ;;  %s2259_s4 = inlined_call_operand.hbm [shape: bf16[2,8,288], index: 4, kind: output, shape index: {}]  }
   0x1   :  { %11 = vsyncpa [#allocation4 + $0x1], 0  ;;  %s1953_s15 = smov 0   ;;  %s1955_s16 = smov 0  }
   0x2   :  { %s1957_s17 = smov 0   ;;  %s1959_s18 = smov 0  }
   0x3   :  { %s1961_s19 = smov 0   ;;  %s1963_s20 = smov 0  }
   0x4 LB: > { %s1617_s21 = sadd.s32 4294967295, %s1912_s20   ;;  %s1618_s22 = sadd.s32 4294967294, %s1912_s20   ;;  %s1912_s20 = sphi %s1963_s20, %s17_s20   ;;  %s1908_s19 = sphi %s1961_s19, %s2266_s19   ;;  %s1904_s18 = sphi %s1959_s18, %s2265_s18   ;;  %s1900_s17 = sphi %s1957_s17, %s2264_s17   ;;  %s1896_s16 = sphi %s1955_s16, %s2263_s16   ;;  %s1892_s15 = sphi %s1953_s15, %s2262_s15  }
   0x5   : > { %s29_s23 = sadd.s32 1, %s1908_s19  ;;  %s136_s24 = sadd.s32 1, %s1900_s17 }
   0x6   : > { %p31_p0 = scmp.ge.s32.totalorder %s29_s23, 2  ;;  %p146_p1 = scmp.ne.s32.totalorder %s1900_s17, %s1896_s16 }
   0x7   : > { %p147_p2 = scmp.eq.s32.totalorder %s1617_s21, 1  ;;  %p152_p3 = scmp.ne.s32.totalorder %s1896_s16, %s1892_s15 }
   0x8   : > { %s2268_s23 = smov (%p31_p0, %s29_s23), 0  ;;  %p153_p5 = scmp.eq.s32.totalorder %s1618_s22, 1 }
   0x9   : > { %p1993_p4 = por %p147_p2, %p146_p1  ;;  %s131_s26 = ssub.s32 %s1908_s19, %s2268_s23 }
   0xa   : > { %p1621_p6 = scmp.ge.s32.totalorder %s1912_s20, 1  ;;  %p134_p7 = scmp.eq.s32.totalorder %s131_s26, 0 }
   0xb   : > { %p2000_p8 = por %p153_p5, %p152_p3  ;;  %p200_p9 = scmp.lt.s32.totalorder %s1912_s20, 3 }
   0xc   : > { %s2006_s28 = scalar_select %p134_p7, %s1900_s17, %s136_s24  }
   0xd   : > { %p201_p10 = pnand %p1621_p6, %p200_p9 }
   0xe   : > { %p238_p11 = scmp.lt.s32.totalorder (!%p201_p10), %s1904_s18, 1  ;;  %vm257_vm0 = vcmask (!%p201_p10), 1041408   ;;  %vm258_vm1 = vcmask (!%p201_p10), 1043458   ;;  %vm260_vm3 = vcmask (!%p201_p10), 259076   ;;  %s1914_s12 = smov (!%p201_p10), 32   ;;  %v279_v4 = vlaneseq (!%p201_p10)  ;;  %v1660_v51 = vld [vmem:[%s2258_s3 + $0x8] sm:$0xff] (!%p201_p10) }
   0xf   : > { %204 = sbr.rel (%p201_p10) target bundleno = 589 (0x24d), region = 36  ;;  %vm259_vm2 = vmor (!%p201_p10), %vm258_vm1, %vm257_vm0  ;;  %v1915_v2 = vmov (!%p201_p10), 1983009808   ;;  %vm268_vm5 = vcmask (!%p201_p10), 697600   ;;  %v1916_v8 = vmov (!%p201_p10), 0.0   ;;  %vm1917_vm6 = vmmov (!%p201_p10), 0  }
  0x10   : > { %vm261_vm4 = vmor (!%p201_p10), %vm260_vm3, %vm259_vm2  ;;  %v277_v3 = vunpack.c.l.s4 (!%p201_p10), %v1915_v2  ;;  %v280_v7 = vshrl.u32 (!%p201_p10), %v279_v4, 7  ;;  %1693 = vmatprep.subr.bf16.mxu1 (!%p201_p10), %v1916_v8  ;;  %1695 = vmatprep.mubr.msk.bf16.mxu1 (!%p201_p10), %vm1917_vm6, %v1916_v8  ;;  %s1918_s13 = smov (!%p201_p10), 127   ;;  %s1919_s14 = smov (!%p201_p10), 126   ;;  %v1920_v21 = vmov (!%p201_p10), 0   ;;  %v1364_v52 = vld [vmem:[%s2258_s3] sm:$0xff] (!%p201_p10)  ;;  %v1661_v53 = vld [vmem:[%s2258_s3 + $0x10] sm:$0xff] (!%p201_p10) }
  0x11   : > { %345 = vmatprep.mubr.bf16.mxu0 (!%p201_p10), %v1920_v21  ;;  %1824 = vset.pattern.permute.xlu1 (!%p201_p10), %v1920_v21  ;;  %s1921_s21 = smov (!%p201_p10), 110   ;;  %s1922_s22 = smov (!%p201_p10), 109   ;;  %v1662_v54 = vld [vmem:[%s2258_s3 + $0x18] sm:$0xff] (!%p201_p10)  ;;  %vm297_vm7 = vcmask (!%p201_p10), 1039360   ;;  %vm300_vm8 = vcmask (!%p201_p10), 31744   ;;  %vm513_vm9 = vcmask (!%p201_p10), 1031168  }
  0x12   : > { %v278_v6 = vunpack.c.0.s8 (!%p201_p10), %v277_v3  ;;  %1825 = vset.pattern.permute.xlu0 (!%p201_p10), %v1920_v21  ;;  %s1923_s24 = smov (!%p201_p10), 108   ;;  %s1924_s26 = smov (!%p201_p10), 92   ;;  %vm638_vm10 = vcmask (!%p201_p10), 900096   ;;  %vm763_vm11 = vcmask (!%p201_p10), 891904   ;;  %vm888_vm12 = vcmask (!%p201_p10), 883712  }
  0x13   : > { %vm1013_vm13 = vcmask (!%p201_p10), 752640   ;;  %vm1138_vm14 = vcmask (!%p201_p10), 744448   ;;  %vm1263_vm15 = vcmask (!%p201_p10), 736256   ;;  %s1927_s10 = smov (!%p201_p10), [#allocation3]  }
  0x14   : > { %v2018_v9 = vsub.s32 (!%p201_p10), %v278_v6, %v280_v7  ;;  %v271_v7 = vld [vmem:[%s2257_s2] sm:$0xf] (!%p201_p10) }
  0x16   : > { %s239_s29 = scalar_select %p238_p11, %s1904_s18, 1 }
  0x18   : > { %s1623_s30 = sshll.u32 %s239_s29, 1  ;;  %s1754_s5 = smul.u32 6, %s239_s29 }
  0x19   : > { %s253_s8 = scalar_lea.vmem %s2256_s1, %s1623_s30  ;;  %s1925_s29 = smov 91  }
  0x1a   : > { %v263_v0 = vld [vmem:[%s253_s8] sm:$0x3]  ;;  %s245_s11 = scalar_lea.vmem %s2255_s0, %s1754_s5  ;;  %s1926_s30 = smov 90  }
  0x1b   : > { %265 = vrot.lane.b32.xlu0 %v263_v0, %s1914_s12  ;;  %v256_v1 = vld [vmem:[%s245_s11] sm:$0x3f]  ;;  %s1838_s11 = sshll.u32 %s1927_s10, 4  ;;  %s1839_s11 = int_to_ptr.vmem [resolvable:$false] %s1838_s11 }
  0x1c   : > { %262 = vst.msk [vmem:[#allocation2] sm:$0x3f] %vm261_vm4, %v256_v1  ;;  %v1624_v0 = vld [vmem:[%s2257_s2 + $0x4] sm:$0xf]  ;;  %s1840_s12 = scalar_lea.vmem %s1839_s11, 384 }
  0x8d   : > { %v266_v5 = vpop.permute.xlu0 %265 }
  0x8e   : > { %269 = vst.msk [vmem:[#allocation2 + $0x4] sm:$0x3] %vm268_vm5, %v266_v5 }
  0x95   : > { %v270_v10 = vld [vmem:[#allocation2] sm:$0x3f] }
  0x96   : > { %v2023_v11 = vrot.slane %v270_v10, %v2018_v9  ;;  %v487_v12 = vld [vmem:[#allocation2] sm:$0x3f]  ;;  %v275_v14 = vcombine.high %v270_v10, %v270_v10 }
  0x97   : > { %v498_v15 = vrot.slane %v487_v12, %v2018_v9  ;;  %v491_v16 = vcombine.high %v487_v12, %v487_v12  ;;  %v612_v17 = vld [vmem:[#allocation2] sm:$0x3f] }
  0x98   : > { %291 = vrot.lane.b32.xlu0 %v2023_v11, %s1918_s13  ;;  %v2028_v13 = vcombine.high %v2023_v11, %v2023_v11  ;;  %v2033_v18 = vrot.slane %v275_v14, %v2018_v9  ;;  %v623_v20 = vrot.slane %v612_v17, %v2018_v9  ;;  %v737_v24 = vld [vmem:[#allocation2] sm:$0x3f]  ;;  %v616_v25 = vcombine.high %v612_v17, %v612_v17  ;;  %v1631_v17 = vld [vmem:[%s2257_s2 + $0x8] sm:$0xf] }
  0x99   : > { %v505_v19 = vrot.slane %v491_v16, %v2018_v9  ;;  %v506_v22 = vcombine.high %v498_v15, %v498_v15  ;;  %v748_v26 = vrot.slane %v737_v24, %v2018_v9  ;;  %v741_v27 = vcombine.high %v737_v24, %v737_v24  ;;  %v862_v28 = vld [vmem:[#allocation2] sm:$0x3f] }
  0x9a   : > { %293 = vrot.lane.b32.xlu1 %v2028_v13, %s1918_s13  ;;  %v631_v23 = vcombine.high %v623_v20, %v623_v20  ;;  %v630_v29 = vrot.slane %v616_v25, %v2018_v9  ;;  %v873_v31 = vrot.slane %v862_v28, %v2018_v9  ;;  %v987_v34 = vld [vmem:[#allocation2] sm:$0x3f]  ;;  %v866_v35 = vcombine.high %v862_v28, %v862_v28 }
  0x9b   : > { %v755_v30 = vrot.slane %v741_v27, %v2018_v9  ;;  %v756_v32 = vcombine.high %v748_v26, %v748_v26  ;;  %v998_v36 = vrot.slane %v987_v34, %v2018_v9  ;;  %v991_v37 = vcombine.high %v987_v34, %v987_v34  ;;  %v1112_v38 = vld [vmem:[#allocation2] sm:$0x3f] }
  0x9c   : > { %507 = vrot.lane.b32.xlu0 %v498_v15, %s1919_s14  ;;  %v881_v33 = vcombine.high %v873_v31, %v873_v31  ;;  %v880_v39 = vrot.slane %v866_v35, %v2018_v9  ;;  %v1123_v41 = vrot.slane %v1112_v38, %v2018_v9  ;;  %v1237_v44 = vld [vmem:[#allocation2] sm:$0x3f]  ;;  %v1116_v45 = vcombine.high %v1112_v38, %v1112_v38 }
  0x9d   : > { %v1005_v40 = vrot.slane %v991_v37, %v2018_v9  ;;  %v1006_v42 = vcombine.high %v998_v36, %v998_v36  ;;  %v1248_v46 = vrot.slane %v1237_v44, %v2018_v9  ;;  %v1241_v47 = vcombine.high %v1237_v44, %v1237_v44 }
  0x9e   : > { %295 = vrot.lane.b32.xlu1 %v2033_v18, %s1918_s13  ;;  %v1131_v43 = vcombine.high %v1123_v41, %v1123_v41  ;;  %v1130_v48 = vrot.slane %v1116_v45, %v2018_v9  ;;  %v404_v2 = vsel %vm257_vm0, %v2033_v18, 0  ;;  %v398_v4 = vsel %vm257_vm0, %v2023_v11, 0 }
  0x9f   : > { %v1255_v49 = vrot.slane %v1241_v47, %v2018_v9  ;;  %v1256_v50 = vcombine.high %v1248_v46, %v1248_v46 }
  0xa0   : > { %511 = vrot.lane.b32.xlu0 %v505_v19, %s1919_s14 }
  0xa2   : > { %509 = vrot.lane.b32.xlu1 %v506_v22, %s1919_s14 }
  0xa4   : > { %634 = vrot.lane.b32.xlu0 %v631_v23, %s1921_s21 }
  0xa6   : > { %632 = vrot.lane.b32.xlu1 %v623_v20, %s1921_s21 }
  0xa8   : > { %757 = vrot.lane.b32.xlu0 %v748_v26, %s1922_s22  ;;  %v1635_v26 = vld [vmem:[%s2257_s2 + $0xc] sm:$0xf] }
  0xaa   : > { %636 = vrot.lane.b32.xlu1 %v630_v29, %s1921_s21 }
  0xac   : > { %761 = vrot.lane.b32.xlu0 %v755_v30, %s1922_s22 }
  0xae   : > { %759 = vrot.lane.b32.xlu1 %v756_v32, %s1922_s22 }
  0xb0   : > { %884 = vrot.lane.b32.xlu0 %v881_v33, %s1923_s24  ;;  %v1639_v33 = vld [vmem:[%s2257_s2 + $0x10] sm:$0xf] }
  0xb2   : > { %882 = vrot.lane.b32.xlu1 %v873_v31, %s1923_s24 }
  0xb4   : > { %1007 = vrot.lane.b32.xlu0 %v998_v36, %s1924_s26 }
  0xb6   : > { %886 = vrot.lane.b32.xlu1 %v880_v39, %s1923_s24  ;;  %s234_s24 = sand.u32 1, %s1896_s16  }
  0xb8   : > { %1011 = vrot.lane.b32.xlu0 %v1005_v40, %s1924_s26 }
  0xba   : > { %1009 = vrot.lane.b32.xlu1 %v1006_v42, %s1924_s26  ;;  %s1753_s26 = smul.u32 12, %s234_s24 }
  0xbc   : > { %1134 = vrot.lane.b32.xlu0 %v1131_v43, %s1925_s29 }
  0xbe   : > { %1132 = vrot.lane.b32.xlu1 %v1123_v41, %s1925_s29  ;;  %v1643_v41 = vld [vmem:[%s2257_s2 + $0x14] sm:$0xf] }
  0xc0   : > { %1257 = vrot.lane.b32.xlu0 %v1248_v46, %s1926_s30 }
  0xc2   : > { %1136 = vrot.lane.b32.xlu1 %v1130_v48, %s1925_s29  ;;  %v1647_v48 = vld [vmem:[%s2257_s2 + $0x18] sm:$0xf]  ;;  %s1755_s29 = smul.u32 192, %s1904_s18  ;;  %s1510_s18 = scalar_lea.sflag [#allocation4], %s234_s24 }
  0xc4   : > { %1261 = vrot.lane.b32.xlu0 %v1255_v49, %s1926_s30  ;;  %s2206_s8 = scalar_lea.hbm %s2259_s4, %s1755_s29 }
  0xc6   : > { %1259 = vrot.lane.b32.xlu1 %v1256_v50, %s1926_s30  ;;  %s236_s30 = scalar_lea.vmem [#allocation3], %s1753_s26 }
  0xc7   : > { %s1526_s5 = sshll.u32 %s236_s30, 4  ;;  %s2208_s5 = int_to_ptr.vmem [resolvable:$true] %s1526_s5 }
  0xc8   : > { %1384 = vperm.xlu0 %1825, %v1364_v52   ;;  %s1834_s9 = scalar_lea.vmem %s2208_s5, 192  ;;  %p1841_p1 = scmp.lt.s32.totalorder %s2208_s5, %s1839_s11 }
  0xc9   : > { %p1835_p12 = scmp.ne.s32.totalorder %s2208_s5, %s1834_s9  ;;  %p1842_p2 = scmp.lt.s32.totalorder %s1840_s12, %s1834_s9 }
  0xca   : > { %1373 = vperm.xlu1 %1824, %v1660_v51  }
  0xcb   : > { %p1836_p13 = pnand %p1835_p12, %p1993_p4  ;;  %p1843_p3 = por %p1842_p2, %p1841_p1 }
  0xcd   : > { %p1837_p0 = pneg %p1836_p13 }
  0xce   : > { %1479 = vperm.xlu1 %1824, %v1661_v53  }
  0xcf   : > { %p1844_p5 = pnand %p1843_p3, %p1837_p0 }
  0xd2   : > { %1487 = vperm.xlu1 %1824, %v1662_v54  }
 0x10a   : > { %v292_v55 = vpop.permute.xlu0 %291 }
 0x10c   : > { %v294_v56 = vpop.permute.xlu1 %293 }
 0x10d   : > { %v298_v58 = vsel %vm297_vm7, %v292_v55, %v294_v56  ;;  %v1651_v55 = vld [vmem:[%s2257_s2 + $0x1c] sm:$0xf] }
 0x10e   : > { %v508_v57 = vpop.permute.xlu0 %507  ;;  %v305_v63 = vsel %vm257_vm0, %v298_v58, 0 }
 0x110   : > { %v296_v59 = vpop.permute.xlu1 %295 }
 0x111   : > { %v299_v60 = vsel %vm297_vm7, %v294_v56, %v296_v59  ;;  %v311_v61 = vsel %vm257_vm0, %v296_v59, 0  ;;  %v1655_v59 = vld [vmem:[%s2257_s2 + $0x20] sm:$0xf] }
 0x112   : > { %v512_v62 = vpop.permute.xlu0 %511  ;;  %1625 = vmatprep.subr.msk.bf16.mxu0 %vm257_vm0, %v299_v60  ;;  %1694 = vmatpush3.bf16.msra.mxu1 %v311_v61  ;;  %v1659_v60 = vld [vmem:[%s2257_s2 + $0x24] sm:$0xf] }
 0x113   : > { %314 = vmatpush1.bf16.msra.mxu0 %v305_v63  ;;  %1699 = vmatprep.subr.bf16.mxu1 %v1916_v8  ;;  %v526_v12 = vsel %vm257_vm0, %v512_v62, 0 }
 0x114   : > { %1628 = vmatprep.subr.msk.bf16.mxu0 %vm257_vm0, %v2028_v13  ;;  %v510_v1 = vpop.permute.xlu1 %509 }
 0x115   : > { %1696 = vmatmul.mubr.msk.bf16.vlgmr.msra.gmra.mrb[0].mxu1 %vm300_vm8, %v1624_v0  ;;  %v515_v5 = vsel %vm513_vm9, %v510_v1, %v512_v62  ;;  %v514_v9 = vsel %vm513_vm9, %v508_v57, %v510_v1 }
 0x116   : > { %v635_v3 = vpop.permute.xlu0 %634  ;;  %1626 = vmatmul.mubr.msk.bf16.vlgmr.msra.gmra.mrb[0].mxu0 %vm300_vm8, %v1624_v0  ;;  %1700 = vmatpush3.bf16.msra.mxu1 %v404_v2  ;;  %v520_v14 = vsel %vm257_vm0, %v514_v9, 0 }
 0x117   : > { %407 = vmatpush1.bf16.msra.mxu0 %v398_v4  ;;  %1701 = vmatprep.mubr.msk.bf16.mxu1 %vm1917_vm6, %v1916_v8 }
 0x118   : > { %1632 = vmatprep.subr.msk.bf16.mxu0 %vm257_vm0, %v515_v5  ;;  %v633_v6 = vpop.permute.xlu1 %632  ;;  %1705 = vmatprep.subr.bf16.mxu1 %v1916_v8 }
 0x119   : > { %438 = vmatprep.mubr.bf16.mxu0 %v1920_v21  ;;  %v639_v18 = vsel %vm638_vm10, %v633_v6, %v635_v3 }
 0x11a   : > { %v758_v10 = vpop.permute.xlu0 %757  ;;  %v645_v22 = vsel %vm257_vm0, %v639_v18, 0 }
 0x11c   : > { %v637_v11 = vpop.permute.xlu1 %636 }
 0x11d   : > { %v640_v13 = vsel %vm638_vm10, %v635_v3, %v637_v11  ;;  %1702 = vmatmul.mubr.msk.bf16.vlgmr.msra.gmra.mrb[4].mxu1 %vm300_vm8, %v271_v7  ;;  %v651_v20 = vsel %vm257_vm0, %v637_v11, 0 }
 0x11e   : > { %1706 = vmatpush3.bf16.msra.mxu1 %v526_v12  ;;  %1629 = vmatmul.mubr.msk.bf16.vlgmr.msra.gmra.mrb[4].mxu0 %vm300_vm8, %v271_v7  ;;  %v762_v16 = vpop.permute.xlu0 %761 }
 0x11f   : > { %529 = vmatpush1.bf16.msra.mxu0 %v520_v14  ;;  %1707 = vmatprep.mubr.msk.bf16.mxu1 %vm1917_vm6, %v1916_v8  ;;  %v2121_v28 = vsel %vm257_vm0, %v762_v16, 0 }
 0x120   : > { %1636 = vmatprep.subr.msk.bf16.mxu0 %vm257_vm0, %v640_v13  ;;  %v760_v15 = vpop.permute.xlu1 %759  ;;  %1711 = vmatprep.subr.bf16.mxu1 %v1916_v8 }
 0x121   : > { %560 = vmatprep.mubr.bf16.mxu0 %v1920_v21  ;;  %v2108_v23 = vsel %vm763_vm11, %v760_v15, %v762_v16  ;;  %v764_v27 = vsel %vm763_vm11, %v758_v10, %v760_v15 }
 0x122   : > { %v885_v24 = vpop.permute.xlu0 %884  ;;  %v2125_v29 = vsel %vm257_vm0, %v764_v27, 0 }
 0x124   : > { %v883_v19 = vpop.permute.xlu1 %882 }
 0x125   : > { %1708 = vmatmul.mubr.msk.bf16.vlgmr.msra.gmra.mrb[8].mxu1 %vm300_vm8, %v1631_v17  ;;  %v889_v34 = vsel %vm888_vm12, %v883_v19, %v885_v24 }
 0x126   : > { %1712 = vmatpush3.bf16.msra.mxu1 %v651_v20  ;;  %1633 = vmatmul.mubr.msk.bf16.vlgmr.msra.gmra.mrb[8].mxu0 %vm300_vm8, %v1631_v17  ;;  %v1008_v30 = vpop.permute.xlu0 %1007  ;;  %v895_v37 = vsel %vm257_vm0, %v889_v34, 0 }
 0x127   : > { %654 = vmatpush1.bf16.msra.mxu0 %v645_v22  ;;  %1713 = vmatprep.mubr.msk.bf16.mxu1 %vm1917_vm6, %v1916_v8 }
 0x128   : > { %1640 = vmatprep.subr.msk.bf16.mxu0 %vm257_vm0, %v2108_v23  ;;  %1717 = vmatprep.subr.bf16.mxu1 %v1916_v8  ;;  %v887_v25 = vpop.permute.xlu1 %886 }
 0x129   : > { %685 = vmatprep.mubr.bf16.mxu0 %v1920_v21  ;;  %v890_v31 = vsel %vm888_vm12, %v885_v24, %v887_v25  ;;  %v901_v36 = vsel %vm257_vm0, %v887_v25, 0 }
 0x12a   : > { %v1012_v35 = vpop.permute.xlu0 %1011 }
 0x12b   : > { %v1026_v44 = vsel %vm257_vm0, %v1012_v35, 0 }
 0x12c   : > { %v1010_v32 = vpop.permute.xlu1 %1009 }
 0x12d   : > { %1714 = vmatmul.mubr.msk.bf16.vlgmr.msra.gmra.mrb[12].mxu1 %vm300_vm8, %v1635_v26  ;;  %v1015_v39 = vsel %vm1013_vm13, %v1010_v32, %v1012_v35  ;;  %v1014_v42 = vsel %vm1013_vm13, %v1008_v30, %v1010_v32 }
 0x12e   : > { %1718 = vmatpush3.bf16.msra.mxu1 %v2121_v28  ;;  %1637 = vmatmul.mubr.msk.bf16.vlgmr.msra.gmra.mrb[12].mxu0 %vm300_vm8, %v1635_v26  ;;  %v1135_v40 = vpop.permute.xlu0 %1134  ;;  %v1020_v45 = vsel %vm257_vm0, %v1014_v42, 0 }
 0x12f   : > { %779 = vmatpush1.bf16.msra.mxu0 %v2125_v29  ;;  %1719 = vmatprep.mubr.msk.bf16.mxu1 %vm1917_vm6, %v1916_v8 }
 0x130   : > { %1644 = vmatprep.subr.msk.bf16.mxu0 %vm257_vm0, %v890_v31  ;;  %1723 = vmatprep.subr.bf16.mxu1 %v1916_v8  ;;  %v1133_v38 = vpop.permute.xlu1 %1132 }
 0x131   : > { %810 = vmatprep.mubr.bf16.mxu0 %v1920_v21  ;;  %v1139_v49 = vsel %vm1138_vm14, %v1133_v38, %v1135_v40 }
 0x132   : > { %v1258_v47 = vpop.permute.xlu0 %1257  ;;  %v1145_v52 = vsel %vm257_vm0, %v1139_v49, 0 }
 0x134   : > { %v1137_v43 = vpop.permute.xlu1 %1136 }
 0x135   : > { %1720 = vmatmul.mubr.msk.bf16.vlgmr.msra.gmra.mrb[16].mxu1 %vm300_vm8, %v1639_v33  ;;  %v1140_v46 = vsel %vm1138_vm14, %v1135_v40, %v1137_v43  ;;  %v1151_v51 = vsel %vm257_vm0, %v1137_v43, 0 }
 0x136   : > { %1724 = vmatpush3.bf16.msra.mxu1 %v901_v36  ;;  %1641 = vmatmul.mubr.msk.bf16.vlgmr.msra.gmra.mrb[16].mxu0 %vm300_vm8, %v1639_v33  ;;  %v1262_v53 = vpop.permute.xlu0 %1261 }
 0x137   : > { %904 = vmatpush1.bf16.msra.mxu0 %v895_v37  ;;  %1725 = vmatprep.mubr.msk.bf16.mxu1 %vm1917_vm6, %v1916_v8  ;;  %v1276_v57 = vsel %vm257_vm0, %v1262_v53, 0 }
 0x138   : > { %1648 = vmatprep.subr.msk.bf16.mxu0 %vm257_vm0, %v1015_v39  ;;  %1729 = vmatprep.subr.bf16.mxu1 %v1916_v8  ;;  %v1260_v50 = vpop.permute.xlu1 %1259 }
 0x139   : > { %935 = vmatprep.mubr.bf16.mxu0 %v1920_v21  ;;  %v1265_v54 = vsel %vm1263_vm15, %v1260_v50, %v1262_v53  ;;  %v1264_v56 = vsel %vm1263_vm15, %v1258_v47, %v1260_v50 }
 0x13a   : > { %v1270_v58 = vsel %vm257_vm0, %v1264_v56, 0 }
 0x13d   : > { %1726 = vmatmul.mubr.msk.bf16.vlgmr.msra.gmra.mrb[20].mxu1 %vm300_vm8, %v1643_v41 }
 0x13e   : > { %1730 = vmatpush3.bf16.msra.mxu1 %v1026_v44  ;;  %1645 = vmatmul.mubr.msk.bf16.vlgmr.msra.gmra.mrb[20].mxu0 %vm300_vm8, %v1643_v41 }
 0x13f   : > { %1029 = vmatpush1.bf16.msra.mxu0 %v1020_v45  ;;  %1731 = vmatprep.mubr.msk.bf16.mxu1 %vm1917_vm6, %v1916_v8 }
 0x140   : > { %1652 = vmatprep.subr.msk.bf16.mxu0 %vm257_vm0, %v1140_v46  ;;  %1735 = vmatprep.subr.bf16.mxu1 %v1916_v8 }
 0x141   : > { %1060 = vmatprep.mubr.bf16.mxu0 %v1920_v21 }
 0x145   : > { %1732 = vmatmul.mubr.msk.bf16.vlgmr.msra.gmra.mrb[24].mxu1 %vm300_vm8, %v1647_v48 }
 0x146   : > { %1736 = vmatpush3.bf16.msra.mxu1 %v1151_v51  ;;  %1649 = vmatmul.mubr.msk.bf16.vlgmr.msra.gmra.mrb[24].mxu0 %vm300_vm8, %v1647_v48 }
 0x147   : > { %1154 = vmatpush1.bf16.msra.mxu0 %v1145_v52  ;;  %1737 = vmatprep.mubr.msk.bf16.mxu1 %vm1917_vm6, %v1916_v8 }
 0x148   : > { %1656 = vmatprep.subr.msk.bf16.mxu0 %vm257_vm0, %v1265_v54  ;;  %1741 = vmatprep.subr.bf16.mxu1 %v1916_v8 }
 0x149   : > { %1185 = vmatprep.mubr.bf16.mxu0 %v1920_v21 }
 0x14d   : > { %1738 = vmatmul.mubr.msk.bf16.vlgmr.msra.gmra.mrb[28].mxu1 %vm300_vm8, %v1651_v55 }
 0x14e   : > { %1742 = vmatpush3.bf16.msra.mxu1 %v1276_v57  ;;  %1653 = vmatmul.mubr.msk.bf16.vlgmr.msra.gmra.mrb[28].mxu0 %vm300_vm8, %v1651_v55 }
 0x14f   : > { %1279 = vmatpush1.bf16.msra.mxu0 %v1270_v58  ;;  %1743 = vmatprep.mubr.msk.bf16.mxu1 %vm1917_vm6, %v1916_v8 }
 0x150   : > { %1663 = vmatprep.subr.msk.bf16.mxu0 %vm257_vm0, %v2108_v23  ;;  %1747 = vmatprep.subr.bf16.mxu1 %v1916_v8  ;;  %vm1507_vm0 = vcmask 257024  }
 0x151   : > { %1310 = vmatprep.mubr.bf16.mxu0 %v1920_v21 }
 0x155   : > { %1744 = vmatmul.mubr.msk.bf16.vlgmr.msra.gmra.mrb[32].mxu1 %vm300_vm8, %v1655_v59 }
 0x156   : > { %1748 = vmatpush3.bf16.msra.mxu1 %v2121_v28  ;;  %1657 = vmatmul.mubr.msk.bf16.vlgmr.msra.gmra.mrb[32].mxu0 %vm300_vm8, %v1655_v59 }
 0x157   : > { %1391 = vmatpush1.bf16.msra.mxu0 %v2125_v29  ;;  %1749 = vmatprep.mubr.msk.bf16.mxu1 %vm1917_vm6, %v1916_v8 }
 0x158   : > { %1422 = vmatprep.mubr.bf16.mxu0 %v1920_v21 }
 0x15d   : > { %1750 = vmatmul.mubr.msk.bf16.vlgmr.msra.gmra.mrb[36].mxu1 %vm300_vm8, %v1659_v60 }
 0x15e   : > { %1664 = vmatmul.mubr.msk.bf16.vlgmr.msra.gmra.mrb[36].mxu0 %vm300_vm8, %v1659_v60 }
 0x1e8   : > { %v388_v61 = vpop.f32.mrb[0].mxu1 }
 0x1e9   : > { %v347_v62 = vpop.f32.mrb[0].mxu0  ;;  %v1697_v63 = vpop.f32.mrb[1].mxu1 }
 0x1ea   : > { %v349_v0 = vpop.f32.mrb[1].mxu0  ;;  %v391_v1 = vpop.f32.mrb[2].mxu1 }
 0x1eb   : > { %v351_v2 = vpop.f32.mrb[2].mxu0  ;;  %v1698_v3 = vpop.f32.mrb[3].mxu1 }
 0x1ec   : > { %v352_v4 = vpop.f32.mrb[3].mxu0 }
 0x1f0   : > { %v481_v5 = vpop.f32.mrb[4].mxu1 }
 0x1f1   : > { %v482_v8 = vadd.f32 %v481_v5, %v388_v61  ;;  %v440_v6 = vpop.f32.mrb[4].mxu0  ;;  %v1703_v21 = vpop.f32.mrb[5].mxu1 }
 0x1f2   : > { %v441_v7 = vadd.f32 %v440_v6, %v347_v62  ;;  %v442_v9 = vpop.f32.mrb[5].mxu0  ;;  %v484_v10 = vpop.f32.mrb[6].mxu1 }
 0x1f3   : > { %v443_v11 = vadd.f32 %v442_v9, %v349_v0  ;;  %v444_v12 = vpop.f32.mrb[6].mxu0  ;;  %v1704_v13 = vpop.f32.mrb[7].mxu1 }
 0x1f4   : > { %v445_v14 = vpop.f32.mrb[7].mxu0 }
 0x1f8   : > { %v603_v15 = vpop.f32.mrb[8].mxu1 }
 0x1f9   : > { %v611_v16 = vadd.f32 %v603_v15, %v482_v8  ;;  %v562_v17 = vpop.f32.mrb[8].mxu0  ;;  %v1709_v18 = vpop.f32.mrb[9].mxu1 }
 0x1fa   : > { %v609_v19 = vadd.f32 %v562_v17, %v441_v7  ;;  %v564_v20 = vpop.f32.mrb[9].mxu0  ;;  %v606_v22 = vpop.f32.mrb[10].mxu1 }
 0x1fb   : > { %v610_v23 = vadd.f32 %v564_v20, %v443_v11  ;;  %v566_v24 = vpop.f32.mrb[10].mxu0  ;;  %v1710_v25 = vpop.f32.mrb[11].mxu1 }
 0x1fc   : > { %v567_v26 = vpop.f32.mrb[11].mxu0  ;;  %v1374_v18 = vpop.permute.xlu1 %1373 }
 0x200   : > { %v728_v27 = vpop.f32.mrb[12].mxu1 }
 0x201   : > { %v736_v28 = vadd.f32 %v728_v27, %v611_v16  ;;  %v687_v29 = vpop.f32.mrb[12].mxu0  ;;  %v1715_v30 = vpop.f32.mrb[13].mxu1 }
 0x202   : > { %v734_v31 = vadd.f32 %v687_v29, %v609_v19  ;;  %v689_v32 = vpop.f32.mrb[13].mxu0  ;;  %v731_v33 = vpop.f32.mrb[14].mxu1 }
 0x203   : > { %v735_v34 = vadd.f32 %v689_v32, %v610_v23  ;;  %v691_v35 = vpop.f32.mrb[14].mxu0  ;;  %v1716_v36 = vpop.f32.mrb[15].mxu1 }
 0x204   : > { %v692_v37 = vpop.f32.mrb[15].mxu0  ;;  %v1385_v32 = vpop.permute.xlu0 %1384 }
 0x208   : > { %v853_v38 = vpop.f32.mrb[16].mxu1 }
 0x209   : > { %v861_v39 = vadd.f32 %v853_v38, %v736_v28  ;;  %v812_v40 = vpop.f32.mrb[16].mxu0  ;;  %v1721_v41 = vpop.f32.mrb[17].mxu1 }
 0x20a   : > { %v859_v42 = vadd.f32 %v812_v40, %v734_v31  ;;  %v814_v43 = vpop.f32.mrb[17].mxu0  ;;  %v856_v44 = vpop.f32.mrb[18].mxu1 }
 0x20b   : > { %v860_v45 = vadd.f32 %v814_v43, %v735_v34  ;;  %v816_v46 = vpop.f32.mrb[18].mxu0  ;;  %v1722_v47 = vpop.f32.mrb[19].mxu1 }
 0x20c   : > { %v817_v48 = vpop.f32.mrb[19].mxu0  ;;  %v1480_v34 = vpop.permute.xlu1 %1479 }
 0x210   : > { %v978_v49 = vpop.f32.mrb[20].mxu1 }
 0x211   : > { %v986_v50 = vadd.f32 %v978_v49, %v861_v39  ;;  %v937_v51 = vpop.f32.mrb[20].mxu0  ;;  %v1727_v52 = vpop.f32.mrb[21].mxu1 }
 0x212   : > { %v984_v53 = vadd.f32 %v937_v51, %v859_v42  ;;  %v939_v54 = vpop.f32.mrb[21].mxu0  ;;  %v981_v55 = vpop.f32.mrb[22].mxu1 }
 0x213   : > { %v985_v56 = vadd.f32 %v939_v54, %v860_v45  ;;  %v941_v57 = vpop.f32.mrb[22].mxu0  ;;  %v1728_v58 = vpop.f32.mrb[23].mxu1 }
 0x214   : > { %v942_v59 = vpop.f32.mrb[23].mxu0  ;;  %v1488_v57 = vpop.permute.xlu1 %1487 }
 0x218   : > { %v1103_v60 = vpop.f32.mrb[24].mxu1 }
 0x219   : > { %v1111_v61 = vadd.f32 %v1103_v60, %v986_v50  ;;  %v1062_v62 = vpop.f32.mrb[24].mxu0  ;;  %v1733_v63 = vpop.f32.mrb[25].mxu1 }
 0x21a   : > { %v1109_v0 = vadd.f32 %v1062_v62, %v984_v53  ;;  %v1064_v1 = vpop.f32.mrb[25].mxu0  ;;  %v1106_v2 = vpop.f32.mrb[26].mxu1 }
 0x21b   : > { %v1110_v3 = vadd.f32 %v1064_v1, %v985_v56  ;;  %v1066_v4 = vpop.f32.mrb[26].mxu0  ;;  %v1734_v5 = vpop.f32.mrb[27].mxu1 }
 0x21c   : > { %v1067_v8 = vpop.f32.mrb[27].mxu0 }
 0x220   : > { %v1228_v6 = vpop.f32.mrb[28].mxu1 }
 0x221   : > { %v1236_v21 = vadd.f32 %v1228_v6, %v1111_v61  ;;  %v1187_v7 = vpop.f32.mrb[28].mxu0  ;;  %v1739_v9 = vpop.f32.mrb[29].mxu1 }
 0x222   : > { %v1234_v10 = vadd.f32 %v1187_v7, %v1109_v0  ;;  %v1189_v11 = vpop.f32.mrb[29].mxu0  ;;  %v1231_v12 = vpop.f32.mrb[30].mxu1 }
 0x223   : > { %v1235_v13 = vadd.f32 %v1189_v11, %v1110_v3  ;;  %v1191_v14 = vpop.f32.mrb[30].mxu0  ;;  %v1740_v15 = vpop.f32.mrb[31].mxu1 }
 0x224   : > { %v1192_v16 = vpop.f32.mrb[31].mxu0 }
 0x228   : > { %v1353_v17 = vpop.f32.mrb[32].mxu1 }
 0x229   : > { %v1361_v19 = vadd.f32 %v1353_v17, %v1236_v21  ;;  %v1312_v20 = vpop.f32.mrb[32].mxu0  ;;  %v1745_v22 = vpop.f32.mrb[33].mxu1 }
 0x22a   : > { %v1359_v23 = vadd.f32 %v1312_v20, %v1234_v10  ;;  %v1314_v24 = vpop.f32.mrb[33].mxu0  ;;  %v1356_v25 = vpop.f32.mrb[34].mxu1 }
 0x22b   : > { %v1360_v26 = vadd.f32 %v1314_v24, %v1235_v13  ;;  %v1316_v27 = vpop.f32.mrb[34].mxu0  ;;  %v1746_v28 = vpop.f32.mrb[35].mxu1  ;;  %v1378_v30 = vadd.f32 %v1374_v18, %v1361_v19 }
 0x22c   : > { %v1317_v29 = vpop.f32.mrb[35].mxu0  ;;  %v1376_v31 = vadd.f32 %v1374_v18, %v1359_v23 }
 0x22d   : > { %v1377_v33 = vadd.f32 %v1374_v18, %v1360_v26  ;;  %v1381_v36 = vmax.f32 %v1378_v30, 0.0 }
 0x22e   : > { %v1379_v40 = vmax.f32 %v1376_v31, 0.0 }
 0x22f   : > { %v1380_v44 = vmax.f32 %v1377_v33, 0.0 }
 0x230   : > { %v1465_v35 = vpop.f32.mrb[36].mxu1 }
 0x231   : > { %v1466_v37 = vadd.f32 %v1465_v35, %v1385_v32  ;;  %v1424_v38 = vpop.f32.mrb[36].mxu0  ;;  %v1751_v39 = vpop.f32.mrb[37].mxu1 }
 0x232   : > { %v1425_v41 = vadd.f32 %v1424_v38, %v1385_v32  ;;  %v1426_v42 = vpop.f32.mrb[37].mxu0  ;;  %v1468_v43 = vpop.f32.mrb[38].mxu1 }
 0x233   : > { %v1473_v45 = vadd.f32 %v1466_v37, %v1381_v36  ;;  %v1427_v46 = vadd.f32 %v1426_v42, %v1385_v32  ;;  %v1428_v47 = vpop.f32.mrb[38].mxu0  ;;  %v1752_v48 = vpop.f32.mrb[39].mxu1 }
 0x234   : > { %v1471_v49 = vadd.f32 %v1425_v41, %v1379_v40  ;;  %v1429_v50 = vpop.f32.mrb[39].mxu0 }
 0x235   : > { %v1476_v51 = vmax.f32 %v1473_v45, 0.0  ;;  %v1472_v52 = vadd.f32 %v1427_v46, %v1380_v44 }
 0x236   : > { %v1474_v53 = vmax.f32 %v1471_v49, 0.0 }
 0x237   : > { %v1484_v54 = vmul.f32 %v1480_v34, %v1476_v51  ;;  %v1475_v55 = vmax.f32 %v1472_v52, 0.0 }
 0x238   : > { %v1482_v56 = vmul.f32 %v1480_v34, %v1474_v53 }
 0x239   : > { %v1492_v58 = vadd.f32 %v1488_v57, %v1484_v54  ;;  %v1483_v59 = vmul.f32 %v1480_v34, %v1475_v55 }
 0x23a   : > { %v1490_v60 = vadd.f32 %v1488_v57, %v1482_v56 }
 0x23b   : > { %v1672_v61 = vpack.c.bf16 %v1492_v58, %v1492_v58  ;;  %v1491_v62 = vadd.f32 %v1488_v57, %v1483_v59 }
 0x23d   : > { %v1671_v63 = vpack.c.bf16 %v1491_v62, %v1490_v60  ;;  %1508 = vst.msk [vmem:[%s236_s30 + $0x8] sm:$0xf] %vm1507_vm0, %v1672_v61 }
 0x23f   : > { %1506 = vst [vmem:[%s236_s30] sm:$0xff] %v1671_v63 }
 0x240   : > { %1847 = shalt.err (!%p1844_p5)
}
 0x241   : > { %s1848_s13 = scalar_lea.hbm %s2206_s8, 192  ;;  %s1852_s22 = scalar_lea.hbm %s2259_s4, 384 }
 0x242   : > { %p1849_p6 = scmp.ne.s32.totalorder %s2206_s8, %s1848_s13  ;;  %p1853_p10 = scmp.lt.u32.totalorder %s2206_s8, %s2259_s4 }
 0x243   : > { %p1854_p11 = scmp.lt.u32.totalorder %s1852_s22, %s1848_s13  ;;  %p1856_p13 = scmp.lt.u32.totalorder %s1848_s13, %s2206_s8 }
 0x244   : > { %p1850_p7 = pnand %p1849_p6, %p1993_p4 }
 0x245   : > { %p1855_p12 = por %p1854_p11, %p1853_p10 }
 0x246   : > { %p1851_p9 = pneg %p1850_p7 }
 0x247   : > { %p1857_p0 = por %p1856_p13, %p1855_p12 }
 0x249   : > { %p1858_p1 = pnand %p1857_p0, %p1851_p9 }
 0x24b   : > { %1861 = shalt.err (!%p1858_p1)
}
 0x24c   : > { %1756 = dma.vmem_to_hbm [thread:$0]  (%p1993_p4), %s2208_s5, 192, %s2206_s8, %s1510_s18  }
 0x24d PF: > { %p1762_p2 = scmp.ge.s32.totalorder %s1912_s20, 2  ;;  %s1538_s29 = sand.u32 1, %s1892_s15  }
 0x24e   : > { %s1539_s30 = scalar_lea.sflag [#allocation4], %s1538_s29 }
 0x24f   : > { %p1759_p3 = pnand %p1762_p2, %p2000_p8 }
 0x251   : > { %1887 = dma.done.wait (!%p1759_p3), %s1539_s30, 192  }
 0x252   : > { %1889 = vsyncadd (!%p1759_p3), %s1539_s30, 4294967104  ;;  %s17_s20 = sadd.s32 1, %s1912_s20   ;;  %s2262_s15 = smov %s1896_s16 }
 0x253   : > { %p14_p5 = scmp.ge.s32.totalorder %s17_s20, 4   ;;  %s2263_s16 = smov %s1900_s17 }
 0x254   : > { %s2264_s17 = smov %s2006_s28  ;;  %s2265_s18 = smov %s1908_s19 }
 0x255   : > { %s2266_s19 = smov %s2268_s23  ;;  %16 = sbr.rel (!%p14_p5) target bundleno = 4 (0x4), region = 86 }
 0x25c   :  { %1544 = vsyncpa [#allocation4], 1 }
 0x25d   :  { %1546 = vsyncpa [#allocation4 + $0x1], 1 }

</bundles_post_ra>
